<compile_context>
chip_gen: v5e
topology: v5e:2x2
jax: 0.10.0
libtpu: 0.0.40
codegen_flags: <defaults>
</compile_context>

<pallas_src>
import functools

import jax
import jax.numpy as jnp
from jax.experimental import pallas as pl
from jax.experimental.pallas import tpu as pltpu

ALPHA = 0.1  # LeakyReLU negative slope


def _leaky_relu(h, alpha):
    return jnp.where(h > 0, h, alpha * h)


def _round_up(n, m):
    return ((n + m - 1) // m) * m


def rcgan_disc_kernel(x_ref, w1_ref, b1_ref, w2_ref, b2_ref, w3t_ref, b3_ref,
                      o_ref, *, alpha, approx_sigmoid):
    """One batch tile of the discriminator MLP.

    x_ref  : (tb, input_size)        compute dtype (f32 or bf16)
    w1_ref : (input_size, num_units) compute dtype;  b1_ref: (1, num_units) f32
    w2_ref : (num_units, num_units)  compute dtype;  b2_ref: (1, num_units) f32
    w3t_ref: (1, num_units) f32 (transposed final weight)
    b3_ref : (1,) f32 scalar in SMEM
    o_ref  : (1, 1, tb) f32 — lane-dense output: batch index along lanes.
    """
    x = x_ref[...]

    # Layer 1: Linear + LeakyReLU (MXU matmul, f32 accumulation).
    h = jnp.dot(x, w1_ref[...], preferred_element_type=jnp.float32)
    h = _leaky_relu(h + b1_ref[...], alpha)

    # Layer 2 (hidden): Linear + LeakyReLU.
    h = jnp.dot(h.astype(w2_ref.dtype), w2_ref[...],
                preferred_element_type=jnp.float32)
    h = _leaky_relu(h + b2_ref[...], alpha)

    # Output layer: Linear(num_units, 1) as VPU multiply + lane reduce (XLU),
    # avoiding an N=1 MXU matmul.  z: (tb,)
    z = jnp.sum(h * w3t_ref[...], axis=-1) + b3_ref[0]

    # Sigmoid: exp on the EUP; reciprocal optionally approximate (EUP slot).
    e = jnp.exp(-z)
    if approx_sigmoid:
        sig = pl.reciprocal(1.0 + e, approx=True)
    else:
        sig = 1.0 / (1.0 + e)

    o_ref[...] = sig[None, None, :].astype(o_ref.dtype)


def rcgan_discriminator2(x, params, *, alpha=ALPHA, batch_tile=512,
                         compute_dtype=jnp.bfloat16, approx_sigmoid=True):
    """Discriminator MLP forward.  x: (B, input_size) f32 -> (B, 1) f32."""
    w1, b1, w2, b2, w3, b3 = params
    B, input_size = x.shape
    num_units = w1.shape[1]

    # Batch tile: large enough to amortise per-step overhead, 128-aligned so
    # the lane-dense output slab is well laid out, but not larger than needed.
    tb = max(128, min(int(batch_tile), _round_up(B, 128)))
    tb = _round_up(tb, 128)
    B_pad = _round_up(B, tb)
    num_tiles = B_pad // tb

    if B_pad != B:
        x = jnp.pad(x, ((0, B_pad - B), (0, 0)))

    # Matmul operands in compute_dtype (bf16 halves DMA bytes / vreg pressure
    # on v6e/v7x); biases and the final dot-product weight stay f32.
    x_c = x.astype(compute_dtype)
    w1_c = w1.astype(compute_dtype)
    w2_c = w2.astype(compute_dtype)
    b1_f = b1.astype(jnp.float32).reshape(1, num_units)
    b2_f = b2.astype(jnp.float32).reshape(1, num_units)
    w3t_f = w3.astype(jnp.float32).reshape(1, num_units)  # (num_units,1) -> row
    b3_f = b3.astype(jnp.float32).reshape(1)

    # Weight/bias blocks: full arrays with constant index maps -> DMA'd once,
    # resident in VMEM across the whole batch grid (no re-DMA per step).
    full = lambda shape: pl.BlockSpec(shape, lambda i: (0,) * len(shape))

    itemsize = jnp.dtype(compute_dtype).itemsize
    cost = pl.CostEstimate(
        flops=2 * B_pad * (input_size * num_units
                           + num_units * num_units
                           + num_units),
        transcendentals=2 * B_pad,  # exp + reciprocal per row
        bytes_accessed=(x_c.size * itemsize
                        + (w1_c.size + w2_c.size) * itemsize
                        + (b1_f.size + b2_f.size + w3t_f.size + b3_f.size) * 4
                        + B_pad * 4),
    )

    out = pl.pallas_call(
        functools.partial(rcgan_disc_kernel, alpha=alpha,
                          approx_sigmoid=approx_sigmoid),
        out_shape=jax.ShapeDtypeStruct((num_tiles, 1, tb), jnp.float32),
        grid_spec=pltpu.PrefetchScalarGridSpec(
            num_scalar_prefetch=0,
            grid=(num_tiles,),
            in_specs=[
                pl.BlockSpec((tb, input_size), lambda i: (i, 0)),
                full((input_size, num_units)),
                full((1, num_units)),
                full((num_units, num_units)),
                full((1, num_units)),
                full((1, num_units)),
                pl.BlockSpec(memory_space=pltpu.MemorySpace.SMEM),
            ],
            out_specs=pl.BlockSpec((1, 1, tb), lambda i: (i, 0, 0)),
        ),
        compiler_params=pltpu.CompilerParams(
            dimension_semantics=("parallel",)),
        cost_estimate=cost,
    )(x_c, w1_c, b1_f, w2_c, b2_f, w3t_f, b3_f)

    # Lane-dense slab (num_tiles, 1, tb) -> (B, 1).
    return out.reshape(-1)[:B].reshape(B, 1)


def init_params(key, input_size, num_units):
    """Deterministic synthetic parameters (Linear weights stored (in, out))."""
    k = jax.random.split(key, 6)
    scale = 0.1
    w1 = scale * jax.random.normal(k[0], (input_size, num_units), jnp.float32)
    b1 = scale * jax.random.normal(k[1], (1, num_units), jnp.float32)
    w2 = scale * jax.random.normal(k[2], (num_units, num_units), jnp.float32)
    b2 = scale * jax.random.normal(k[3], (1, num_units), jnp.float32)
    w3 = scale * jax.random.normal(k[4], (num_units, 1), jnp.float32)
    b3 = scale * jax.random.normal(k[5], (1, 1), jnp.float32)
    return (w1, b1, w2, b2, w3, b3)


def reference_forward(x, params, alpha=ALPHA):
    """Pure-JAX reference matching the PyTorch forward."""
    w1, b1, w2, b2, w3, b3 = params
    h = x @ w1 + b1
    h = jnp.where(h > 0, h, alpha * h)
    h = h @ w2 + b2
    h = jnp.where(h > 0, h, alpha * h)
    z = h @ w3 + b3
    return jax.nn.sigmoid(z)


if __name__ == "__main__":
    # Small shapes consistent with the module:
    #   input_feature_shape  = (batch, seq=8, feat=4)  -> 8*4 = 32
    #   input_attribute_shape = (batch, attr=4)        -> 4
    #   input_size = 4 + 32 = 36, num_units = 32, num_layers = 3
    batch = 2
    seq, feat, attr = 8, 4, 4
    input_size = attr + seq * feat  # 36
    num_units = 32

    key = jax.random.PRNGKey(0)
    kx, kp, kx2 = jax.random.split(key, 3)

    # x is the already-flattened (attributes ++ features) input, as the
    # PyTorch forward expects a 2-D tensor of shape (batch, input_size).
    x = jax.random.normal(kx, (batch, input_size), jnp.float32)
    params = init_params(kp, input_size, num_units)
    y_ref = reference_forward(x, params)

    # 1) Exact path (f32 matmuls, exact divide): tight correctness check.
    y_f32 = rcgan_discriminator2(x, params, compute_dtype=jnp.float32,
                                 approx_sigmoid=False)
    y_f32 = jax.block_until_ready(y_f32)
    assert y_f32.shape == (batch, 1)
    assert jnp.allclose(y_f32, y_ref, atol=1e-5, rtol=1e-5), (y_f32, y_ref)

    # 2) Fast path (bf16 matmul inputs, approx reciprocal): loose check.
    y_fast = rcgan_discriminator2(x, params)
    y_fast = jax.block_until_ready(y_fast)
    assert y_fast.shape == (batch, 1)
    assert jnp.allclose(y_fast, y_ref, atol=2e-2, rtol=2e-2), (y_fast, y_ref)

    # 3) Multi-tile grid exercise (several 128-row batch tiles).
    big_batch = 300
    xb = jax.random.normal(kx2, (big_batch, input_size), jnp.float32)
    yb = rcgan_discriminator2(xb, params, batch_tile=128,
                              compute_dtype=jnp.float32, approx_sigmoid=False)
    yb = jax.block_until_ready(yb)
    assert yb.shape == (big_batch, 1)
    assert jnp.allclose(yb, reference_forward(xb, params),
                        atol=1e-5, rtol=1e-5)

    print("KERNEL_OK")
</pallas_src>

<mosaic_0001>
module attributes {stable_mosaic.version = 11 : i64} {
  func.func @rcgan_disc_kernel(%arg0: i32, %arg1: memref<128x36xf32, #tpu.memory_space<vmem>>, %arg2: memref<36x32xf32, #tpu.memory_space<vmem>>, %arg3: memref<1x32xf32, #tpu.memory_space<vmem>>, %arg4: memref<32x32xf32, #tpu.memory_space<vmem>>, %arg5: memref<1x32xf32, #tpu.memory_space<vmem>>, %arg6: memref<1x32xf32, #tpu.memory_space<vmem>>, %arg7: memref<1xf32, #tpu.memory_space<smem>>, %arg8: memref<1x1x128xf32, #tpu.memory_space<vmem>>) attributes {dimension_semantics = [#tpu.dimension_semantics<parallel>], iteration_bounds = array<i64: 1>, scalar_prefetch = 0 : i64, scratch_operands = 0 : i64, tpu.core_type = #tpu.core_type<tc>, window_params = [{transform_indices = @transform_0, window_bounds = array<i64: 128, 36>}, {pipeline_mode = #tpu.pipeline_mode<synchronous>, transform_indices = @transform_1, window_bounds = array<i64: 36, 32>}, {pipeline_mode = #tpu.pipeline_mode<synchronous>, transform_indices = @transform_2, window_bounds = array<i64: 1, 32>}, {pipeline_mode = #tpu.pipeline_mode<synchronous>, transform_indices = @transform_3, window_bounds = array<i64: 32, 32>}, {pipeline_mode = #tpu.pipeline_mode<synchronous>, transform_indices = @transform_4, window_bounds = array<i64: 1, 32>}, {pipeline_mode = #tpu.pipeline_mode<synchronous>, transform_indices = @transform_5, window_bounds = array<i64: 1, 32>}, {transform_indices = @transform_6, window_bounds = array<i64: 1>}, {transform_indices = @transform_7, window_bounds = array<i64: 1, 1, 128>}]} {
    %c0 = arith.constant 0 : index
    %c0_0 = arith.constant 0 : index
    %0 = vector.load %arg1[%c0, %c0_0] : memref<128x36xf32, #tpu.memory_space<vmem>>, vector<128x36xf32>
    %c0_1 = arith.constant 0 : index
    %c0_2 = arith.constant 0 : index
    %1 = vector.load %arg2[%c0_1, %c0_2] : memref<36x32xf32, #tpu.memory_space<vmem>>, vector<36x32xf32>
    %cst = arith.constant dense<0.000000e+00> : vector<128x32xf32>
    %2 = tpu.matmul %0, %1, %cst {dimension_numbers = #tpu.dot_dimension_numbers<[1], [0], [0], [1], [0, 0, 1, 1], [], []>} : vector<128x36xf32>, vector<36x32xf32>, vector<128x32xf32> -> vector<128x32xf32>
    %c0_3 = arith.constant 0 : index
    %c0_4 = arith.constant 0 : index
    %3 = vector.load %arg3[%c0_3, %c0_4] : memref<1x32xf32, #tpu.memory_space<vmem>>, vector<1x32xf32>
    %4 = vector.broadcast %3 : vector<1x32xf32> to vector<128x32xf32>
    %5 = arith.addf %2, %4 : vector<128x32xf32>
    %cst_5 = arith.constant 0.000000e+00 : f32
    %6 = vector.broadcast %cst_5 : f32 to vector<128x32xf32>
    %7 = arith.cmpf ogt, %5, %6 : vector<128x32xf32>
    %cst_6 = arith.constant 1.000000e-01 : f32
    %8 = vector.broadcast %cst_6 : f32 to vector<128x32xf32>
    %9 = arith.mulf %8, %5 : vector<128x32xf32>
    %10 = arith.select %7, %5, %9 : vector<128x32xi1>, vector<128x32xf32>
    %c0_7 = arith.constant 0 : index
    %c0_8 = arith.constant 0 : index
    %11 = vector.load %arg4[%c0_7, %c0_8] : memref<32x32xf32, #tpu.memory_space<vmem>>, vector<32x32xf32>
    %cst_9 = arith.constant dense<0.000000e+00> : vector<128x32xf32>
    %12 = tpu.matmul %10, %11, %cst_9 {dimension_numbers = #tpu.dot_dimension_numbers<[1], [0], [0], [1], [0, 0, 1, 1], [], []>} : vector<128x32xf32>, vector<32x32xf32>, vector<128x32xf32> -> vector<128x32xf32>
    %c0_10 = arith.constant 0 : index
    %c0_11 = arith.constant 0 : index
    %13 = vector.load %arg5[%c0_10, %c0_11] : memref<1x32xf32, #tpu.memory_space<vmem>>, vector<1x32xf32>
    %14 = vector.broadcast %13 : vector<1x32xf32> to vector<128x32xf32>
    %15 = arith.addf %12, %14 : vector<128x32xf32>
    %cst_12 = arith.constant 0.000000e+00 : f32
    %16 = vector.broadcast %cst_12 : f32 to vector<128x32xf32>
    %17 = arith.cmpf ogt, %15, %16 : vector<128x32xf32>
    %cst_13 = arith.constant 1.000000e-01 : f32
    %18 = vector.broadcast %cst_13 : f32 to vector<128x32xf32>
    %19 = arith.mulf %18, %15 : vector<128x32xf32>
    %20 = arith.select %17, %15, %19 : vector<128x32xi1>, vector<128x32xf32>
    %c0_14 = arith.constant 0 : index
    %c0_15 = arith.constant 0 : index
    %21 = vector.load %arg6[%c0_14, %c0_15] : memref<1x32xf32, #tpu.memory_space<vmem>>, vector<1x32xf32>
    %22 = vector.broadcast %21 : vector<1x32xf32> to vector<128x32xf32>
    %23 = arith.mulf %20, %22 : vector<128x32xf32>
    %cst_16 = arith.constant dense<0.000000e+00> : vector<128xf32>
    %24 = vector.multi_reduction <add>, %23, %cst_16 [1] : vector<128x32xf32> to vector<128xf32>
    %c0_17 = arith.constant 0 : index
    %25 = memref.load %arg7[%c0_17] : memref<1xf32, #tpu.memory_space<smem>>
    %26 = vector.broadcast %25 : f32 to vector<128xf32>
    %27 = arith.addf %24, %26 : vector<128xf32>
    %cst_18 = arith.constant 0.000000e+00 : f32
    %28 = vector.broadcast %cst_18 : f32 to vector<128xf32>
    %29 = arith.subf %28, %27 : vector<128xf32>
    %30 = math.exp %29 : vector<128xf32>
    %cst_19 = arith.constant 1.000000e+00 : f32
    %31 = vector.broadcast %cst_19 : f32 to vector<128xf32>
    %32 = arith.addf %31, %30 : vector<128xf32>
    %cst_20 = arith.constant 1.000000e+00 : f32
    %33 = vector.broadcast %cst_20 : f32 to vector<128xf32>
    %34 = arith.divf %33, %32 : vector<128xf32>
    %35 = vector.shape_cast %34 : vector<128xf32> to vector<1x1x128xf32>
    %c0_21 = arith.constant 0 : index
    %c0_22 = arith.constant 0 : index
    %c0_23 = arith.constant 0 : index
    %36 = vector.load %arg8[%c0_21, %c0_22, %c0_23] : memref<1x1x128xf32, #tpu.memory_space<vmem>>, vector<1x1x128xf32>
    tpu.vector_store %arg8[%c0_21, %c0_22, %c0_23], %35 {strides = array<i32>} : memref<1x1x128xf32, #tpu.memory_space<vmem>>, vector<1x1x128xf32>,
    return
  }
  func.func @transform_0(%arg0: i32) -> (i32, i32) {
    %c0_i32 = arith.constant 0 : i32
    %c0_i32_0 = arith.constant 0 : i32
    return %arg0, %c0_i32 : i32, i32
  }
  func.func @transform_1(%arg0: i32) -> (i32, i32) {
    %c0_i32 = arith.constant 0 : i32
    %c0_i32_0 = arith.constant 0 : i32
    %c0_i32_1 = arith.constant 0 : i32
    return %c0_i32, %c0_i32_0 : i32, i32
  }
  func.func @transform_2(%arg0: i32) -> (i32, i32) {
    %c0_i32 = arith.constant 0 : i32
    %c0_i32_0 = arith.constant 0 : i32
    %c0_i32_1 = arith.constant 0 : i32
    return %c0_i32, %c0_i32_0 : i32, i32
  }
  func.func @transform_3(%arg0: i32) -> (i32, i32) {
    %c0_i32 = arith.constant 0 : i32
    %c0_i32_0 = arith.constant 0 : i32
    %c0_i32_1 = arith.constant 0 : i32
    return %c0_i32, %c0_i32_0 : i32, i32
  }
  func.func @transform_4(%arg0: i32) -> (i32, i32) {
    %c0_i32 = arith.constant 0 : i32
    %c0_i32_0 = arith.constant 0 : i32
    %c0_i32_1 = arith.constant 0 : i32
    return %c0_i32, %c0_i32_0 : i32, i32
  }
  func.func @transform_5(%arg0: i32) -> (i32, i32) {
    %c0_i32 = arith.constant 0 : i32
    %c0_i32_0 = arith.constant 0 : i32
    %c0_i32_1 = arith.constant 0 : i32
    return %c0_i32, %c0_i32_0 : i32, i32
  }
  func.func @transform_6(%arg0: i32) -> i32 {
    %c0_i32 = arith.constant 0 : i32
    %c0_i32_0 = arith.constant 0 : i32
    return %c0_i32 : i32
  }
  func.func @transform_7(%arg0: i32) -> (i32, i32, i32) {
    %c0_i32 = arith.constant 0 : i32
    %c0_i32_0 = arith.constant 0 : i32
    %c0_i32_1 = arith.constant 0 : i32
    return %arg0, %c0_i32, %c0_i32_0 : i32, i32, i32
  }
}

</mosaic_0001>

<bundles_post_ra>
// kernel: tpu_custom_call.1
= control target key start
LH: loop header
LB: loop body
LE: loop exit
PB: predicated region body
PF: predicated region fallthrough
CT: control target
= control target key end

     0   :  { %vm102_vm0 = vcmask 1043456   ;;  %s1741_s0 = inlined_call_operand.vmem [shape: f32[128,36], index: 0, kind: input, shape index: {}]   ;;  %s1742_s1 = inlined_call_operand.vmem [shape: f32[36,32], index: 1, kind: input, shape index: {}]   ;;  %s1743_s2 = inlined_call_operand.vmem [shape: f32[1,32], index: 2, kind: input, shape index: {}]   ;;  %s1744_s3 = inlined_call_operand.vmem [shape: f32[32,32], index: 3, kind: input, shape index: {}]   ;;  %s1745_s4 = inlined_call_operand.vmem [shape: f32[1,32], index: 4, kind: input, shape index: {}]   ;;  %s1746_s5 = inlined_call_operand.vmem [shape: f32[1,32], index: 5, kind: input, shape index: {}]   ;;  %s1747_s6 = inlined_call_operand.<no memory space> [shape: f32[1], index: 6, kind: input, shape index: {}]   ;;  %s1748_s7 = inlined_call_operand.hbm [shape: f32[1,1,128], index: 7, kind: output, shape index: {}]  }
   0x1   :  { %v48_v0 = vld [vmem:[%s1742_s1 + $0x20] sm:$0xf]  ;;  %v47_v1 = vld [vmem:[%s1742_s1 + $0x18] sm:$0xff]  ;;  %v46_v2 = vld [vmem:[%s1742_s1 + $0x10] sm:$0xff] }
   0x2   :  { %876 = vmatpush.msk.msra.mxu0 %vm102_vm0, %v48_v0  ;;  %909 = vmatpush.msk.msra.mxu2 %vm102_vm0, %v48_v0  ;;  %v45_v3 = vld [vmem:[%s1742_s1 + $0x8] sm:$0xff] }
   0x4   :  { %118 = vmatpush.msra.mxu0 %v47_v1  ;;  %910 = vmatpush.msra.mxu2 %v47_v1 }
   0x6   :  { %119 = vmatpush.msra.mxu0 %v46_v2  ;;  %911 = vmatpush.msra.mxu2 %v46_v2 }
   0x7   :  { %13 = vsyncpa [#allocation4], 0  ;;  %v44_v4 = vld [vmem:[%s1742_s1] sm:$0xff]  ;;  %vm53_vm1 = vcmask 293888   ;;  %v29_v7 = vld [vmem:[%s1741_s0 + $0x8] sm:$0xff]  ;;  %vm227_vm3 = vcmask 261120  }
   0x8   :  { %120 = vmatpush.msra.mxu0 %v45_v3  ;;  %912 = vmatpush.msra.mxu2 %v45_v3  ;;  %v28_v5 = vld [vmem:[%s1741_s0] sm:$0xff]  ;;  %v37_v8 = vld [vmem:[%s1741_s0 + $0x48] sm:$0xff]  ;;  %v30_v9 = vld [vmem:[%s1741_s0 + $0x10] sm:$0xff]  ;;  %s867_s9 = sshll.u32 %s1748_s7, 4  ;;  %s868_s9 = int_to_ptr.hbm [resolvable:$true] %s867_s9 }
   0x9   :  { %v36_v6 = vld [vmem:[%s1741_s0 + $0x40] sm:$0xff]  ;;  %v38_v10 = vld [vmem:[%s1741_s0 + $0x50] sm:$0xff]  ;;  %v31_v11 = vld [vmem:[%s1741_s0 + $0x18] sm:$0xff] }
   0xa   :  { %121 = vmatpush.msra.mxu0 %v44_v4  ;;  %913 = vmatpush.msra.mxu2 %v44_v4  ;;  %v39_v12 = vld [vmem:[%s1741_s0 + $0x58] sm:$0xff]  ;;  %v32_v14 = vld [vmem:[%s1741_s0 + $0x20] sm:$0xff]  ;;  %v33_v16 = vld [vmem:[%s1741_s0 + $0x28] sm:$0xff] }
   0xb   :  { %877 = vmatmul.msk.f32.vlgmr.msra.gmra.mxu0 %vm53_vm1, %v28_v5  ;;  %885 = vmatmul.msk.f32.vlgmr.msra.gmra.mxu2 %vm53_vm1, %v36_v6  ;;  %v222_v13 = vld [vmem:[%s1744_s3 + $0x18] sm:$0xff]  ;;  %v40_v15 = vld [vmem:[%s1741_s0 + $0x60] sm:$0xff]  ;;  %v41_v17 = vld [vmem:[%s1741_s0 + $0x68] sm:$0xff] }
   0xc   :  { %288 = vmatpush.msra.mxu1 %v222_v13  ;;  %914 = vmatpush.msra.mxu3 %v222_v13  ;;  %v34_v18 = vld [vmem:[%s1741_s0 + $0x30] sm:$0xff]  ;;  %v35_v20 = vld [vmem:[%s1741_s0 + $0x38] sm:$0xff]  ;;  %v220_v23 = vld [vmem:[%s1744_s3 + $0x8] sm:$0xff] }
   0xd   :  { %v42_v19 = vld [vmem:[%s1741_s0 + $0x70] sm:$0xff]  ;;  %v43_v21 = vld [vmem:[%s1741_s0 + $0x78] sm:$0xff]  ;;  %v219_v24 = vld [vmem:[%s1744_s3] sm:$0xff] }
   0xe   :  { %v221_v22 = vld [vmem:[%s1744_s3 + $0x10] sm:$0xff]  ;;  %v1147_v25 = vld [vmem:[%s1743_s2] ss:$0 sm:$0xff] }
   0xf   :  { %289 = vmatpush.msra.mxu1 %v221_v22  ;;  %915 = vmatpush.msra.mxu3 %v221_v22 }
  0x11   :  { %290 = vmatpush.msra.mxu1 %v220_v23  ;;  %916 = vmatpush.msra.mxu3 %v220_v23 }
  0x13   :  { %878 = vmatmul.msk.f32.gmra.mxu0 %vm53_vm1, %v29_v7  ;;  %886 = vmatmul.msk.f32.gmra.mxu2 %vm53_vm1, %v37_v8 }
  0x14   :  { %291 = vmatpush.msra.mxu1 %v219_v24  ;;  %917 = vmatpush.msra.mxu3 %v219_v24 }
  0x1b   :  { %879 = vmatmul.msk.f32.gmra.mxu0 %vm53_vm1, %v30_v9  ;;  %887 = vmatmul.msk.f32.gmra.mxu2 %vm53_vm1, %v38_v10 }
  0x23   :  { %880 = vmatmul.msk.f32.gmra.mxu0 %vm53_vm1, %v31_v11  ;;  %888 = vmatmul.msk.f32.gmra.mxu2 %vm53_vm1, %v39_v12 }
  0x2b   :  { %881 = vmatmul.msk.f32.gmra.mxu0 %vm53_vm1, %v32_v14  ;;  %889 = vmatmul.msk.f32.gmra.mxu2 %vm53_vm1, %v40_v15 }
  0x33   :  { %882 = vmatmul.msk.f32.gmra.mxu0 %vm53_vm1, %v33_v16  ;;  %890 = vmatmul.msk.f32.gmra.mxu2 %vm53_vm1, %v41_v17 }
  0x3b   :  { %883 = vmatmul.msk.f32.gmra.mxu0 %vm53_vm1, %v34_v18  ;;  %891 = vmatmul.msk.f32.gmra.mxu2 %vm53_vm1, %v42_v19 }
  0x43   :  { %884 = vmatmul.msk.f32.gmra.mxu0 %vm53_vm1, %v35_v20  ;;  %892 = vmatmul.msk.f32.gmra.mxu2 %vm53_vm1, %v43_v21 }
  0x88   :  { %v123_v26 = vpop.f32.mrf.mxu0 }
  0x89   :  { %v124_v27 = vadd.f32 %v1147_v25, %v123_v26 }
  0x8b   :  { %v187_v28 = vmul.f32 0.1, %v124_v27  ;;  %vm171_vm2 = vcmp.gt.f32.partialorder %v124_v27, 0.0 }
  0x8d   :  { %v203_v29 = vsel %vm171_vm2, %v124_v27, %v187_v28  ;;  %v1187_v27 = vld [vmem:[%s1745_s4] ss:$0 sm:$0xff] }
  0x8e   :  { %v1150_v30 = vpop.f32.mrf.mxu2  ;;  %893 = vmatmul.msk.f32.vlgmr.msra.gmra.mxu1 %vm227_vm3, %v203_v29 }
  0x8f   :  { %v148_v18 = vadd.f32 %v1147_v25, %v1150_v30 }
  0x90   :  { %v126_v31 = vpop.f32.mrf.mxu0 }
  0x91   :  { %v127_v32 = vadd.f32 %v1147_v25, %v126_v31  ;;  %v195_v22 = vmul.f32 0.1, %v148_v18  ;;  %vm179_vm2 = vcmp.gt.f32.partialorder %v148_v18, 0.0 }
  0x93   :  { %v188_v33 = vmul.f32 0.1, %v127_v32  ;;  %vm172_vm4 = vcmp.gt.f32.partialorder %v127_v32, 0.0  ;;  %v211_v26 = vsel %vm179_vm2, %v148_v18, %v195_v22 }
  0x95   :  { %v204_v34 = vsel %vm172_vm4, %v127_v32, %v188_v33 }
  0x96   :  { %v150_v35 = vpop.f32.mrf.mxu2  ;;  %894 = vmatmul.msk.f32.gmra.mxu1 %vm227_vm3, %v204_v34 }
  0x97   :  { %v151_v36 = vadd.f32 %v1147_v25, %v150_v35 }
  0x98   :  { %v129_v37 = vpop.f32.mrf.mxu0 }
  0x99   :  { %v196_v38 = vmul.f32 0.1, %v151_v36  ;;  %v130_v39 = vadd.f32 %v1147_v25, %v129_v37  ;;  %vm180_vm5 = vcmp.gt.f32.partialorder %v151_v36, 0.0 }
  0x9b   :  { %v189_v40 = vmul.f32 0.1, %v130_v39  ;;  %v212_v41 = vsel %vm180_vm5, %v151_v36, %v196_v38  ;;  %vm173_vm6 = vcmp.gt.f32.partialorder %v130_v39, 0.0 }
  0x9c   :  { %902 = vmatmul.msk.f32.vlgmr.msra.gmra.mxu3 %vm227_vm3, %v212_v41 }
  0x9d   :  { %v205_v42 = vsel %vm173_vm6, %v130_v39, %v189_v40 }
  0x9e   :  { %v153_v43 = vpop.f32.mrf.mxu2  ;;  %895 = vmatmul.msk.f32.gmra.mxu1 %vm227_vm3, %v205_v42 }
  0x9f   :  { %v154_v44 = vadd.f32 %v1147_v25, %v153_v43 }
  0xa0   :  { %v132_v45 = vpop.f32.mrf.mxu0 }
  0xa1   :  { %v197_v46 = vmul.f32 0.1, %v154_v44  ;;  %v133_v47 = vadd.f32 %v1147_v25, %v132_v45  ;;  %vm181_vm7 = vcmp.gt.f32.partialorder %v154_v44, 0.0 }
  0xa3   :  { %v190_v48 = vmul.f32 0.1, %v133_v47  ;;  %v213_v49 = vsel %vm181_vm7, %v154_v44, %v197_v46  ;;  %vm174_vm8 = vcmp.gt.f32.partialorder %v133_v47, 0.0 }
  0xa4   :  { %903 = vmatmul.msk.f32.gmra.mxu3 %vm227_vm3, %v213_v49 }
  0xa5   :  { %v206_v50 = vsel %vm174_vm8, %v133_v47, %v190_v48 }
  0xa6   :  { %v156_v51 = vpop.f32.mrf.mxu2  ;;  %896 = vmatmul.msk.f32.gmra.mxu1 %vm227_vm3, %v206_v50 }
  0xa7   :  { %v157_v52 = vadd.f32 %v1147_v25, %v156_v51 }
  0xa8   :  { %v135_v53 = vpop.f32.mrf.mxu0 }
  0xa9   :  { %v198_v54 = vmul.f32 0.1, %v157_v52  ;;  %v136_v55 = vadd.f32 %v1147_v25, %v135_v53  ;;  %vm182_vm9 = vcmp.gt.f32.partialorder %v157_v52, 0.0 }
  0xab   :  { %v191_v56 = vmul.f32 0.1, %v136_v55  ;;  %v214_v57 = vsel %vm182_vm9, %v157_v52, %v198_v54  ;;  %vm175_vm10 = vcmp.gt.f32.partialorder %v136_v55, 0.0 }
  0xac   :  { %904 = vmatmul.msk.f32.gmra.mxu3 %vm227_vm3, %v214_v57 }
  0xad   :  { %v207_v58 = vsel %vm175_vm10, %v136_v55, %v191_v56 }
  0xae   :  { %v159_v59 = vpop.f32.mrf.mxu2  ;;  %897 = vmatmul.msk.f32.gmra.mxu1 %vm227_vm3, %v207_v58 }
  0xaf   :  { %v160_v60 = vadd.f32 %v1147_v25, %v159_v59 }
  0xb0   :  { %v138_v61 = vpop.f32.mrf.mxu0 }
  0xb1   :  { %v199_v62 = vmul.f32 0.1, %v160_v60  ;;  %v139_v63 = vadd.f32 %v1147_v25, %v138_v61  ;;  %vm183_vm11 = vcmp.gt.f32.partialorder %v160_v60, 0.0 }
  0xb3   :  { %v192_v0 = vmul.f32 0.1, %v139_v63  ;;  %v215_v1 = vsel %vm183_vm11, %v160_v60, %v199_v62  ;;  %vm176_vm12 = vcmp.gt.f32.partialorder %v139_v63, 0.0 }
  0xb4   :  { %905 = vmatmul.msk.f32.gmra.mxu3 %vm227_vm3, %v215_v1 }
  0xb5   :  { %v208_v2 = vsel %vm176_vm12, %v139_v63, %v192_v0 }
  0xb6   :  { %v162_v3 = vpop.f32.mrf.mxu2  ;;  %898 = vmatmul.msk.f32.gmra.mxu1 %vm227_vm3, %v208_v2 }
  0xb7   :  { %v163_v4 = vadd.f32 %v1147_v25, %v162_v3 }
  0xb8   :  { %v141_v5 = vpop.f32.mrf.mxu0 }
  0xb9   :  { %v200_v6 = vmul.f32 0.1, %v163_v4  ;;  %v142_v7 = vadd.f32 %v1147_v25, %v141_v5  ;;  %vm184_vm13 = vcmp.gt.f32.partialorder %v163_v4, 0.0 }
  0xbb   :  { %v193_v8 = vmul.f32 0.1, %v142_v7  ;;  %v216_v9 = vsel %vm184_vm13, %v163_v4, %v200_v6  ;;  %vm177_vm14 = vcmp.gt.f32.partialorder %v142_v7, 0.0 }
  0xbc   :  { %906 = vmatmul.msk.f32.gmra.mxu3 %vm227_vm3, %v216_v9 }
  0xbd   :  { %v209_v10 = vsel %vm177_vm14, %v142_v7, %v193_v8 }
  0xbe   :  { %v165_v11 = vpop.f32.mrf.mxu2  ;;  %899 = vmatmul.msk.f32.gmra.mxu1 %vm227_vm3, %v209_v10 }
  0xbf   :  { %v166_v12 = vadd.f32 %v1147_v25, %v165_v11 }
  0xc0   :  { %v144_v13 = vpop.f32.mrf.mxu0 }
  0xc1   :  { %v201_v14 = vmul.f32 0.1, %v166_v12  ;;  %v145_v15 = vadd.f32 %v1147_v25, %v144_v13  ;;  %vm185_vm15 = vcmp.gt.f32.partialorder %v166_v12, 0.0 }
  0xc3   :  { %v194_v16 = vmul.f32 0.1, %v145_v15  ;;  %v217_v17 = vsel %vm185_vm15, %v166_v12, %v201_v14  ;;  %vm178_vm0 = vcmp.gt.f32.partialorder %v145_v15, 0.0 }
  0xc4   :  { %907 = vmatmul.msk.f32.gmra.mxu3 %vm227_vm3, %v217_v17 }
  0xc5   :  { %v210_v19 = vsel %vm178_vm0, %v145_v15, %v194_v16 }
  0xc6   :  { %v168_v20 = vpop.f32.mrf.mxu2  ;;  %900 = vmatmul.msk.f32.gmra.mxu1 %vm227_vm3, %v210_v19 }
  0xc7   :  { %v169_v21 = vadd.f32 %v1147_v25, %v168_v20  ;;  %v1193_v25 = vld [vmem:[%s1746_s5] ss:$0 sm:$0xff] }
  0xc9   :  { %v202_v23 = vmul.f32 0.1, %v169_v21  ;;  %vm186_vm1 = vcmp.gt.f32.partialorder %v169_v21, 0.0 }
  0xcb   :  { %v218_v24 = vsel %vm186_vm1, %v169_v21, %v202_v23 }
  0xcc   :  { %908 = vmatmul.msk.f32.gmra.mxu3 %vm227_vm3, %v218_v24 }
  0xce   :  { %901 = vmatmul.msk.f32.gmra.mxu1 %vm227_vm3, %v211_v26 }
 0x10b   :  { %v293_v28 = vpop.f32.mrf.mxu1 }
 0x10c   :  { %v294_v29 = vadd.f32 %v1187_v27, %v293_v28 }
 0x10e   :  { %v357_v30 = vmul.f32 0.1, %v294_v29  ;;  %vm341_vm4 = vcmp.gt.f32.partialorder %v294_v29, 0.0 }
 0x110   :  { %v373_v31 = vsel %vm341_vm4, %v294_v29, %v357_v30 }
 0x111   :  { %v393_v32 = vmul.f32 %v1193_v25, %v373_v31 }
 0x113   :  { %v296_v33 = vpop.f32.mrf.mxu1  ;;  %v409_v34 = vsel %vm227_vm3, %v393_v32, 0.0 }
 0x114   :  { %v297_v35 = vadd.f32 %v1187_v27, %v296_v33  ;;  %410 = vadd.xlane.f32.xlu0 %v409_v34 }
 0x116   :  { %vm342_vm5 = vcmp.gt.f32.partialorder %v297_v35, 0.0  ;;  %v358_v36 = vmul.f32 0.1, %v297_v35 }
 0x118   :  { %v374_v37 = vsel %vm342_vm5, %v297_v35, %v358_v36 }
 0x119   :  { %v394_v38 = vmul.f32 %v1193_v25, %v374_v37 }
 0x11b   :  { %v299_v39 = vpop.f32.mrf.mxu1  ;;  %v412_v40 = vsel %vm227_vm3, %v394_v38, 0.0 }
 0x11c   :  { %v300_v41 = vadd.f32 %v1187_v27, %v299_v39  ;;  %413 = vadd.xlane.f32.xlu0 %v412_v40 }
 0x11e   :  { %v359_v42 = vmul.f32 0.1, %v300_v41  ;;  %vm343_vm6 = vcmp.gt.f32.partialorder %v300_v41, 0.0 }
 0x11f   :  { %v320_v43 = vpop.f32.mrf.mxu3 }
 0x120   :  { %v321_v44 = vadd.f32 %v1187_v27, %v320_v43  ;;  %v375_v45 = vsel %vm343_vm6, %v300_v41, %v359_v42 }
 0x121   :  { %v395_v46 = vmul.f32 %v1193_v25, %v375_v45 }
 0x122   :  { %vm350_vm7 = vcmp.gt.f32.partialorder %v321_v44, 0.0  ;;  %v366_v47 = vmul.f32 0.1, %v321_v44 }
 0x123   :  { %v302_v48 = vpop.f32.mrf.mxu1  ;;  %v415_v49 = vsel %vm227_vm3, %v395_v46, 0.0 }
 0x124   :  { %v303_v50 = vadd.f32 %v1187_v27, %v302_v48  ;;  %416 = vadd.xlane.f32.xlu1 %v415_v49  ;;  %v382_v51 = vsel %vm350_vm7, %v321_v44, %v366_v47 }
 0x125   :  { %v402_v52 = vmul.f32 %v1193_v25, %v382_v51 }
 0x126   :  { %vm344_vm8 = vcmp.gt.f32.partialorder %v303_v50, 0.0  ;;  %v360_v53 = vmul.f32 0.1, %v303_v50 }
 0x127   :  { %v323_v54 = vpop.f32.mrf.mxu3  ;;  %v436_v55 = vsel %vm227_vm3, %v402_v52, 0.0 }
 0x128   :  { %v324_v56 = vadd.f32 %v1187_v27, %v323_v54  ;;  %437 = vadd.xlane.f32.xlu0 %v436_v55  ;;  %v376_v57 = vsel %vm344_vm8, %v303_v50, %v360_v53 }
 0x129   :  { %v396_v58 = vmul.f32 %v1193_v25, %v376_v57 }
 0x12a   :  { %vm351_vm9 = vcmp.gt.f32.partialorder %v324_v56, 0.0  ;;  %v367_v59 = vmul.f32 0.1, %v324_v56 }
 0x12b   :  { %v305_v60 = vpop.f32.mrf.mxu1  ;;  %v418_v61 = vsel %vm227_vm3, %v396_v58, 0.0 }
 0x12c   :  { %v306_v62 = vadd.f32 %v1187_v27, %v305_v60  ;;  %419 = vadd.xlane.f32.xlu1 %v418_v61  ;;  %v383_v63 = vsel %vm351_vm9, %v324_v56, %v367_v59  ;;  %v1245_v61 = vstv %s1747_s6  ;;  %s1012_s6 = smov [#allocation3]  }
 0x12d   :  { %v403_v2 = vmul.f32 %v1193_v25, %v383_v63  ;;  %s865_s29 = sshll.u32 %s1012_s6, 4  ;;  %s866_s29 = int_to_ptr.vmem [resolvable:$true] %s865_s29 }
 0x12e   :  { %v361_v0 = vmul.f32 0.1, %v306_v62  ;;  %vm345_vm10 = vcmp.gt.f32.partialorder %v306_v62, 0.0 }
 0x12f   :  { %v326_v1 = vpop.f32.mrf.mxu3  ;;  %v439_v9 = vsel %vm227_vm3, %v403_v2, 0.0 }
 0x130   :  { %v327_v3 = vadd.f32 %v1187_v27, %v326_v1  ;;  %v377_v4 = vsel %vm345_vm10, %v306_v62, %v361_v0 }
 0x131   :  { %v397_v5 = vmul.f32 %v1193_v25, %v377_v4 }
 0x132   :  { %vm352_vm11 = vcmp.gt.f32.partialorder %v327_v3, 0.0  ;;  %v368_v6 = vmul.f32 0.1, %v327_v3 }
 0x133   :  { %v308_v7 = vpop.f32.mrf.mxu1  ;;  %v421_v8 = vsel %vm227_vm3, %v397_v5, 0.0 }
 0x134   :  { %v309_v10 = vadd.f32 %v1187_v27, %v308_v7  ;;  %422 = vadd.xlane.f32.xlu2 %v421_v8  ;;  %440 = vadd.xlane.f32.xlu1 %v439_v9  ;;  %v384_v11 = vsel %vm352_vm11, %v327_v3, %v368_v6 }
 0x135   :  { %v404_v13 = vmul.f32 %v1193_v25, %v384_v11 }
 0x136   :  { %v362_v14 = vmul.f32 0.1, %v309_v10  ;;  %vm346_vm12 = vcmp.gt.f32.partialorder %v309_v10, 0.0 }
 0x137   :  { %v329_v12 = vpop.f32.mrf.mxu3  ;;  %v442_v16 = vsel %vm227_vm3, %v404_v13, 0.0 }
 0x138   :  { %v330_v17 = vadd.f32 %v1187_v27, %v329_v12  ;;  %v378_v19 = vsel %vm346_vm12, %v309_v10, %v362_v14 }
 0x139   :  { %v398_v22 = vmul.f32 %v1193_v25, %v378_v19 }
 0x13a   :  { %v369_v23 = vmul.f32 0.1, %v330_v17  ;;  %vm353_vm14 = vcmp.gt.f32.partialorder %v330_v17, 0.0 }
 0x13b   :  { %v311_v15 = vpop.f32.mrf.mxu1  ;;  %v424_v29 = vsel %vm227_vm3, %v398_v22, 0.0 }
 0x13c   :  { %v312_v18 = vadd.f32 %v1187_v27, %v311_v15  ;;  %443 = vadd.xlane.f32.xlu2 %v442_v16  ;;  %v385_v33 = vsel %vm353_vm14, %v330_v17, %v369_v23  ;;  %vm800_vm14 = vcmask 130112  }
 0x13d   :  { %v405_v36 = vmul.f32 %v1193_v25, %v385_v33 }
 0x13e   :  { %vm347_vm13 = vcmp.gt.f32.partialorder %v312_v18, 0.0  ;;  %v363_v20 = vmul.f32 0.1, %v312_v18 }
 0x13f   :  { %v332_v21 = vpop.f32.mrf.mxu3  ;;  %v445_v42 = vsel %vm227_vm3, %v405_v36, 0.0 }
 0x140   :  { %v379_v24 = vsel %vm347_vm13, %v312_v18, %v363_v20  ;;  %v333_v31 = vadd.f32 %v1187_v27, %v332_v21 }
 0x141   :  { %v399_v26 = vmul.f32 %v1193_v25, %v379_v24 }
 0x142   :  { %v370_v37 = vmul.f32 0.1, %v333_v31  ;;  %vm354_vm0 = vcmp.gt.f32.partialorder %v333_v31, 0.0 }
 0x143   :  { %v314_v28 = vpop.f32.mrf.mxu1  ;;  %v427_v30 = vsel %vm227_vm3, %v399_v26, 0.0 }
 0x144   :  { %v315_v32 = vadd.f32 %v1187_v27, %v314_v28  ;;  %425 = vadd.xlane.f32.xlu2 %v424_v29  ;;  %428 = vadd.xlane.f32.xlu0 %v427_v30  ;;  %v386_v45 = vsel %vm354_vm0, %v333_v31, %v370_v37 }
 0x145   :  { %v406_v48 = vmul.f32 %v1193_v25, %v386_v45 }
 0x146   :  { %vm348_vm15 = vcmp.gt.f32.partialorder %v315_v32, 0.0  ;;  %v364_v34 = vmul.f32 0.1, %v315_v32 }
 0x147   :  { %v335_v35 = vpop.f32.mrf.mxu3  ;;  %v448_v55 = vsel %vm227_vm3, %v406_v48, 0.0 }
 0x148   :  { %v380_v38 = vsel %vm348_vm15, %v315_v32, %v364_v34  ;;  %v336_v43 = vadd.f32 %v1187_v27, %v335_v35  ;;  %v795_v34 = vlaneseq }
 0x149   :  { %v400_v39 = vmul.f32 %v1193_v25, %v380_v38 }
 0x14a   :  { %v371_v49 = vmul.f32 0.1, %v336_v43  ;;  %vm355_vm2 = vcmp.gt.f32.partialorder %v336_v43, 0.0 }
 0x14b   :  { %v317_v40 = vpop.f32.mrf.mxu1  ;;  %v430_v41 = vsel %vm227_vm3, %v400_v39, 0.0 }
 0x14c   :  { %v318_v44 = vadd.f32 %v1187_v27, %v317_v40  ;;  %431 = vadd.xlane.f32.xlu1 %v430_v41  ;;  %446 = vadd.xlane.f32.xlu0 %v445_v42  ;;  %v387_v57 = vsel %vm355_vm2, %v336_v43, %v371_v49 }
 0x14e   :  { %vm349_vm1 = vcmp.gt.f32.partialorder %v318_v44, 0.0  ;;  %v365_v46 = vmul.f32 0.1, %v318_v44 }
 0x14f   :  { %v338_v47 = vpop.f32.mrf.mxu3 }
 0x150   :  { %v339_v50 = vadd.f32 %v1187_v27, %v338_v47  ;;  %v381_v51 = vsel %vm349_vm1, %v318_v44, %v365_v46  ;;  %v407_v27 = vmul.f32 %v1193_v25, %v387_v57  ;;  %v1273_v44 = vand.u32 127, %v795_v34 }
 0x151   :  { %v401_v52 = vmul.f32 %v1193_v25, %v381_v51 }
 0x152   :  { %vm356_vm4 = vcmp.gt.f32.partialorder %v339_v50, 0.0  ;;  %v372_v53 = vmul.f32 0.1, %v339_v50  ;;  %v451_v60 = vsel %vm227_vm3, %v407_v27, 0.0 }
 0x153   :  { %v433_v54 = vsel %vm227_vm3, %v401_v52, 0.0  ;;  %v1284_v52 = vadd.s32 4294967288, %v1273_v44 }
 0x154   :  { %434 = vadd.xlane.f32.xlu2 %v433_v54  ;;  %449 = vadd.xlane.f32.xlu1 %v448_v55  ;;  %v388_v56 = vsel %vm356_vm4, %v339_v50, %v372_v53 }
 0x155   :  { %v408_v58 = vmul.f32 %v1193_v25, %v388_v56 }
 0x157   :  { %v454_v59 = vsel %vm227_vm3, %v408_v58, 0.0 }
 0x158   :  { %455 = vadd.xlane.f32.xlu0 %v454_v59  ;;  %v1298_v59 = vadd.s32 4294967280, %v1273_v44 }
 0x15c   :  { %452 = vadd.xlane.f32.xlu2 %v451_v60 }
 0x187   :  { %v411_v62 = vpop.xlane.xlu0 %410 }
 0x188   :  { %v459_v63 = vadd.f32 %v1245_v61, %v411_v62 }
 0x18a   :  { %v475_v0 = vsub.f32 0.0, %v459_v63 }
 0x18c   :  { %v491_v1 = vmul.f32 1.442695, %v475_v0 }
 0x18e   :  { %922 = vpow2.f32 %v491_v1 }
 0x18f   :  { %v414_v2 = vpop.xlane.xlu0 %413 }
 0x190   :  { %v460_v3 = vadd.f32 %v1245_v61, %v414_v2 }
 0x192   :  { %v476_v4 = vsub.f32 0.0, %v460_v3 }
 0x194   :  { %v923_v25 = vpop.eup %922  ;;  %v493_v5 = vmul.f32 1.442695, %v476_v4 }
 0x195   :  { %v523_v6 = vadd.f32 1.0, %v923_v25  ;;  %v1315_v25 = vadd.s32 4294967224, %v1273_v44 }
 0x196   :  { %924 = vpow2.f32 %v493_v5  ;;  %v1318_v5 = vadd.s32 4294967272, %v1273_v44 }
 0x197   :  { %v417_v7 = vpop.xlane.xlu1 %416  ;;  %926 = vrcp.f32 %v523_v6  ;;  %v548_v45 = vand.u32 2147483647, %v523_v6  ;;  %v550_v46 = vand.u32 2147483648, %v523_v6  ;;  %vm544_vm5 = vweird.f32 %v523_v6 }
 0x198   :  { %v461_v8 = vadd.f32 %v1245_v61, %v417_v7 }
 0x199   :  { %vm1293_vm7 = vcmp.eq.f32.partialorder %v548_v45, 8.507059e+37  ;;  %v551_v58 = vor.u32 1.1754944e-38, %v550_v46 }
 0x19a   :  { %v477_v9 = vsub.f32 0.0, %v461_v8 }
 0x19b   :  { %v438_v10 = vpop.xlane.xlu0 %437 }
 0x19c   :  { %v925_v11 = vpop.eup %924  ;;  %v495_v12 = vmul.f32 1.442695, %v477_v9  ;;  %v468_v13 = vadd.f32 %v1245_v61, %v438_v10 }
 0x19d   :  { %v1251_v14 = vadd.f32 1.0, %v925_v11  ;;  %v1253_v16 = vpop.eup %926 }
 0x19e   :  { %928 = vpow2.f32 %v495_v12  ;;  %v484_v15 = vsub.f32 0.0, %v468_v13  ;;  %v540_v20 = vmul.f32 %v1253_v16, %v523_v6  ;;  %vm545_vm3 = vweird.f32 %v1253_v16 }
 0x19f   :  { %930 = vrcp.f32 %v1251_v14  ;;  %v420_v17 = vpop.xlane.xlu1 %419  ;;  %v563_v53 = vand.u32 2147483647, %v1251_v14  ;;  %vm1289_vm6 = vmor %vm544_vm5, %vm545_vm3  ;;  %v565_v62 = vand.u32 2147483648, %v1251_v14  ;;  %vm559_vm9 = vweird.f32 %v1251_v14 }
 0x1a0   :  { %v509_v18 = vmul.f32 1.442695, %v484_v15  ;;  %v462_v19 = vadd.f32 %v1245_v61, %v420_v17  ;;  %v541_v28 = vsub.f32 1.0, %v540_v20  ;;  %v1341_v17 = vadd.s32 4294967264, %v1273_v44 }
 0x1a1   :  { %vm1310_vm10 = vcmp.eq.f32.partialorder %v563_v53, 8.507059e+37  ;;  %v566_v12 = vor.u32 1.1754944e-38, %v565_v62  ;;  %vm804_vm5 = vcmask 195712  }
 0x1a2   :  { %932 = vpow2.f32 %v509_v18  ;;  %v478_v21 = vsub.f32 0.0, %v462_v19  ;;  %v542_v37 = vmul.f32 %v1253_v16, %v541_v28 }
 0x1a4   :  { %v929_v22 = vpop.eup %928  ;;  %v497_v23 = vmul.f32 1.442695, %v478_v21  ;;  %v543_v48 = vadd.f32 %v1253_v16, %v542_v37 }
 0x1a5   :  { %v1258_v24 = vpop.eup %930  ;;  %v1260_v26 = vadd.f32 1.0, %v929_v22 }
 0x1a6   :  { %934 = vpow2.f32 %v497_v23  ;;  %v555_v29 = vmul.f32 %v1258_v24, %v1251_v14  ;;  %v547_v60 = vsel %vm1289_vm6, %v1253_v16, %v543_v48  ;;  %vm560_vm8 = vweird.f32 %v1258_v24 }
 0x1a7   :  { %936 = vrcp.f32 %v1260_v26  ;;  %v423_v30 = vpop.xlane.xlu2 %422  ;;  %v441_v31 = vpop.xlane.xlu1 %440  ;;  %v1324_v7 = vsel %vm1293_vm7, %v551_v58, %v547_v60  ;;  %v578_v8 = vand.u32 2147483647, %v1260_v26  ;;  %vm1329_vm11 = vmor %vm559_vm9, %vm560_vm8  ;;  %vm574_vm12 = vweird.f32 %v1260_v26 }
 0x1a8   :  { %v933_v32 = vpop.eup %932  ;;  %v463_v33 = vadd.f32 %v1245_v61, %v423_v30  ;;  %v469_v36 = vadd.f32 %v1245_v61, %v441_v31  ;;  %v556_v39 = vsub.f32 1.0, %v555_v29  ;;  %v797_v20 = vperm.slane %v1324_v7, %v1273_v44 }
 0x1a9   :  { %v1266_v35 = vadd.f32 1.0, %v933_v32  ;;  %v580_v21 = vand.u32 2147483648, %v1260_v26  ;;  %vm1348_vm13 = vcmp.eq.f32.partialorder %v578_v8, 8.507059e+37  ;;  %vm808_vm9 = vcmask 261312  }
 0x1aa   :  { %v479_v38 = vsub.f32 0.0, %v463_v33  ;;  %v485_v42 = vsub.f32 0.0, %v469_v36  ;;  %v557_v50 = vmul.f32 %v1258_v24, %v556_v39 }
 0x1ab   :  { %938 = vrcp.f32 %v1266_v35  ;;  %v685_v22 = vand.u32 2147483648, %v1266_v35  ;;  %v683_v29 = vand.u32 2147483647, %v1266_v35  ;;  %vm679_vm0 = vweird.f32 %v1266_v35 }
 0x1ac   :  { %v935_v40 = vpop.eup %934  ;;  %v499_v41 = vmul.f32 1.442695, %v479_v38  ;;  %v511_v54 = vmul.f32 1.442695, %v485_v42  ;;  %v558_v1 = vadd.f32 %v1258_v24, %v557_v50 }
 0x1ad   :  { %v1271_v43 = vpop.eup %936  ;;  %v1275_v47 = vadd.f32 1.0, %v935_v40  ;;  %v581_v40 = vor.u32 1.1754944e-38, %v580_v21  ;;  %vm1381_vm3 = vcmp.eq.f32.partialorder %v683_v29, 8.507059e+37 }
 0x1ae   :  { %v570_v49 = vmul.f32 %v1271_v43, %v1260_v26  ;;  %940 = vpow2.f32 %v499_v41  ;;  %v562_v16 = vsel %vm1329_vm11, %v1258_v24, %v558_v1  ;;  %vm575_vm15 = vweird.f32 %v1271_v43 }
 0x1af   :  { %942 = vrcp.f32 %v1275_v47  ;;  %v444_v51 = vpop.xlane.xlu2 %443  ;;  %v567_v32 = vsel %vm1310_vm10, %v566_v12, %v562_v16  ;;  %v686_v41 = vor.u32 1.1754944e-38, %v685_v22  ;;  %v593_v42 = vand.u32 2147483647, %v1275_v47  ;;  %vm1370_vm1 = vmor %vm574_vm12, %vm575_vm15 }
 0x1b0   :  { %v470_v27 = vadd.f32 %v1245_v61, %v444_v51  ;;  %v571_v63 = vsub.f32 1.0, %v570_v49  ;;  %944 = vpow2.f32 %v511_v54  ;;  %v799_v46 = vperm.slane %v567_v32, %v1284_v52 }
 0x1b1   :  { %v1287_v55 = vpop.eup %938  ;;  %vm589_vm2 = vweird.f32 %v1275_v47  ;;  %v595_v49 = vand.u32 2147483648, %v1275_v47  ;;  %vm1390_vm7 = vcmp.eq.f32.partialorder %v593_v42, 8.507059e+37 }
 0x1b2   :  { %v675_v0 = vmul.f32 %v1287_v55, %v1266_v35  ;;  %v486_v2 = vsub.f32 0.0, %v470_v27  ;;  %v572_v13 = vmul.f32 %v1271_v43, %v571_v63  ;;  %vm680_vm4 = vweird.f32 %v1287_v55 }
 0x1b3   :  { %vm1400_vm8 = vmor %vm679_vm0, %vm680_vm4  ;;  %v596_v4 = vor.u32 1.1754944e-38, %v595_v49  ;;  %v1485_v49 = vadd.s32 4294967232, %v1273_v44  ;;  %v1497_v27 = vadd.s32 4294967208, %v1273_v44 }
 0x1b4   :  { %v941_v3 = vpop.eup %940  ;;  %v513_v10 = vmul.f32 1.442695, %v486_v2  ;;  %v676_v14 = vsub.f32 1.0, %v675_v0  ;;  %v573_v33 = vadd.f32 %v1271_v43, %v572_v13  ;;  %v1405_v0 = vadd.s32 4294967256, %v1273_v44 }
 0x1b5   :  { %v1320_v6 = vpop.eup %942  ;;  %v1327_v9 = vadd.f32 1.0, %v941_v3 }
 0x1b6   :  { %v585_v15 = vmul.f32 %v1320_v6, %v1275_v47  ;;  %v945_v28 = vpop.eup %944  ;;  %v677_v34 = vmul.f32 %v1287_v55, %v676_v14  ;;  %v577_v50 = vsel %vm1370_vm1, %v1271_v43, %v573_v33  ;;  %vm590_vm6 = vweird.f32 %v1320_v6 }
 0x1b7   :  { %946 = vrcp.f32 %v1327_v9  ;;  %v426_v18 = vpop.xlane.xlu2 %425  ;;  %v429_v19 = vpop.xlane.xlu0 %428  ;;  %v1361_v37 = vadd.f32 1.0, %v945_v28  ;;  %v582_v3 = vsel %vm1348_vm13, %v581_v40, %v577_v50  ;;  %vm1415_vm10 = vmor %vm589_vm2, %vm590_vm6  ;;  %vm604_vm12 = vweird.f32 %v1327_v9 }
 0x1b8   :  { %v586_v23 = vsub.f32 1.0, %v585_v15  ;;  %948 = vpow2.f32 %v513_v10  ;;  %v464_v30 = vadd.f32 %v1245_v61, %v426_v18  ;;  %v465_v31 = vadd.f32 %v1245_v61, %v429_v19 }
 0x1b9   :  { %950 = vrcp.f32 %v1361_v37  ;;  %v678_v54 = vadd.f32 %v1287_v55, %v677_v34  ;;  %v608_v10 = vand.u32 2147483647, %v1327_v9  ;;  %v610_v18 = vand.u32 2147483648, %v1327_v9 }
 0x1ba   :  { %v587_v36 = vmul.f32 %v1320_v6, %v586_v23  ;;  %v480_v38 = vsub.f32 0.0, %v464_v30  ;;  %v481_v39 = vsub.f32 0.0, %v465_v31  ;;  %v803_v22 = vperm.slane %v582_v3, %v1298_v59 }
 0x1bb   :  { %v682_v12 = vsel %vm1400_vm8, %v1287_v55, %v678_v54  ;;  %v801_v55 = vsel %vm800_vm14, %v799_v46, %v797_v20  ;;  %v1444_v28 = vadd.s32 4294967216, %v1273_v44  ;;  %vm812_vm13 = vcmask 326912  }
 0x1bc   :  { %v501_v52 = vmul.f32 1.442695, %v480_v38  ;;  %v588_v56 = vadd.f32 %v1320_v6, %v587_v36  ;;  %v503_v57 = vmul.f32 1.442695, %v481_v39  ;;  %v1448_v7 = vsel %vm1381_vm3, %v686_v41, %v682_v12 }
 0x1bd   :  { %v1365_v45 = vpop.eup %946  ;;  %v700_v30 = vand.u32 2147483648, %v1361_v37  ;;  %vm609_vm15 = vcmp.eq.f32.partialorder %v608_v10, 8.507059e+37  ;;  %v611_v34 = vor.u32 1.1754944e-38, %v610_v18  ;;  %v805_v38 = vsel %vm804_vm5, %v803_v22, %v801_v55 }
 0x1be   :  { %v600_v26 = vmul.f32 %v1365_v45, %v1327_v9  ;;  %v949_v53 = vpop.eup %948  ;;  %952 = vpow2.f32 %v501_v52  ;;  %v592_v13 = vsel %vm1415_vm10, %v1320_v6, %v588_v56  ;;  %vm605_vm11 = vweird.f32 %v1365_v45 }
 0x1bf   :  { %v432_v43 = vpop.xlane.xlu1 %431  ;;  %v447_v58 = vpop.xlane.xlu0 %446  ;;  %v1394_v62 = vadd.f32 1.0, %v949_v53  ;;  %954 = vpow2.f32 %v503_v57  ;;  %v597_v23 = vsel %vm1390_vm7, %v596_v4, %v592_v13  ;;  %vm1452_vm14 = vmor %vm604_vm12, %vm605_vm11  ;;  %v831_v39 = vperm.slane %v1448_v7, %v1315_v25 }
 0x1c0   :  { %v601_v60 = vsub.f32 1.0, %v600_v26  ;;  %v466_v1 = vadd.f32 %v1245_v61, %v432_v43  ;;  %v471_v2 = vadd.f32 %v1245_v61, %v447_v58  ;;  %v1421_v11 = vpop.eup %950  ;;  %v807_v33 = vperm.slane %v597_v23, %v1318_v5 }
 0x1c1   :  { %v690_v16 = vmul.f32 %v1421_v11, %v1361_v37  ;;  %956 = vrcp.f32 %v1394_v62  ;;  %v1472_v40 = vadd.s32 4294967248, %v1273_v44  ;;  %v1475_v41 = vadd.s32 4294967240, %v1273_v44 }
 0x1c2   :  { %v602_v8 = vmul.f32 %v1365_v45, %v601_v60  ;;  %v482_v47 = vsub.f32 0.0, %v466_v1  ;;  %v487_v14 = vsub.f32 0.0, %v471_v2  ;;  %vm694_vm0 = vweird.f32 %v1361_v37 }
 0x1c3   :  { %v691_v59 = vsub.f32 1.0, %v690_v16  ;;  %v698_v46 = vand.u32 2147483647, %v1361_v37  ;;  %v1482_v48 = vor.u32 1.1754944e-38, %v700_v30  ;;  %v809_v51 = vsel %vm808_vm9, %v807_v33, %v805_v38 }
 0x1c4   :  { %v603_v15 = vadd.f32 %v1365_v45, %v602_v8  ;;  %v505_v19 = vmul.f32 1.442695, %v482_v47  ;;  %v515_v6 = vmul.f32 1.442695, %v487_v14  ;;  %v953_v21 = vpop.eup %952  ;;  %v713_v52 = vand.u32 2147483647, %v1394_v62 }
 0x1c5   :  { %v955_v24 = vpop.eup %954  ;;  %v1456_v29 = vadd.f32 1.0, %v953_v21  ;;  %v692_v5 = vmul.f32 %v1421_v11, %v691_v59  ;;  %vm695_vm1 = vweird.f32 %v1421_v11  ;;  %vm1513_vm4 = vcmp.eq.f32.partialorder %v698_v46, 8.507059e+37 }
 0x1c6   :  { %958 = vpow2.f32 %v505_v19  ;;  %v607_v9 = vsel %vm1452_vm14, %v1365_v45, %v603_v15  ;;  %v1462_v31 = vadd.f32 1.0, %v955_v24  ;;  %v715_v45 = vand.u32 2147483648, %v1394_v62  ;;  %vm1527_vm3 = vmor %vm694_vm0, %vm695_vm1 }
 0x1c7   :  { %960 = vpow2.f32 %v515_v6  ;;  %v435_v32 = vpop.xlane.xlu2 %434  ;;  %v1466_v36 = vpop.eup %956  ;;  %v612_v42 = vsel %vm609_vm15, %v611_v34, %v607_v9  ;;  %v693_v63 = vadd.f32 %v1421_v11, %v692_v5  ;;  %vm619_vm2 = vweird.f32 %v1456_v29 }
 0x1c8   :  { %962 = vrcp.f32 %v1456_v29  ;;  %v705_v26 = vmul.f32 %v1466_v36, %v1394_v62  ;;  %v467_v53 = vadd.f32 %v1245_v61, %v435_v32  ;;  %v450_v54 = vpop.xlane.xlu1 %449  ;;  %v811_v57 = vperm.slane %v612_v42, %v1341_v17 }
 0x1c9   :  { %964 = vrcp.f32 %v1462_v31  ;;  %v1502_v1 = vor.u32 1.1754944e-38, %v715_v45  ;;  %v472_v35 = vadd.f32 %v1245_v61, %v450_v54  ;;  %v623_v12 = vand.u32 2147483647, %v1456_v29 }
 0x1ca   :  { %v483_v3 = vsub.f32 0.0, %v467_v53  ;;  %v706_v10 = vsub.f32 1.0, %v705_v26  ;;  %v1521_v47 = vsel %vm812_vm13, %v811_v57, %v809_v51  ;;  %vm710_vm5 = vweird.f32 %v1466_v36 }
 0x1cb   :  { %v456_v58 = vpop.xlane.xlu0 %455  ;;  %v625_v16 = vand.u32 2147483648, %v1456_v29  ;;  %v697_v19 = vsel %vm1527_vm3, %v1421_v11, %v693_v63  ;;  %vm634_vm7 = vweird.f32 %v1462_v31  ;;  %v638_v37 = vand.u32 2147483647, %v1462_v31 }
 0x1cc   :  { %v959_v50 = vpop.eup %958  ;;  %v474_v13 = vadd.f32 %v1245_v61, %v456_v58  ;;  %vm709_vm8 = vweird.f32 %v1394_v62  ;;  %v507_v22 = vmul.f32 1.442695, %v483_v3  ;;  %v488_v23 = vsub.f32 0.0, %v472_v35 }
 0x1cd   :  { %v961_v56 = vpop.eup %960  ;;  %v1494_v43 = vadd.f32 1.0, %v959_v50  ;;  %v707_v24 = vmul.f32 %v1466_v36, %v706_v10  ;;  %vm1544_vm9 = vcmp.eq.f32.partialorder %v623_v12, 8.507059e+37  ;;  %vm816_vm10 = vcmask 392512  }
 0x1ce   :  { %v1499_v60 = vpop.eup %962  ;;  %v1505_v2 = vadd.f32 1.0, %v961_v56  ;;  %v490_v11 = vsub.f32 0.0, %v474_v13  ;;  %v517_v33 = vmul.f32 1.442695, %v488_v23  ;;  %v640_v50 = vand.u32 2147483648, %v1462_v31 }
 0x1cf   :  { %v615_v17 = vmul.f32 %v1499_v60, %v1456_v29  ;;  %966 = vrcp.f32 %v1494_v43  ;;  %v1511_v4 = vpop.eup %964  ;;  %v453_v18 = vpop.xlane.xlu2 %452  ;;  %vm620_vm6 = vweird.f32 %v1499_v60  ;;  %vm1573_vm13 = vcmp.eq.f32.partialorder %v713_v52, 8.507059e+37 }
 0x1d0   :  { %968 = vrcp.f32 %v1505_v2  ;;  %v630_v55 = vmul.f32 %v1511_v4, %v1462_v31  ;;  %v473_v59 = vadd.f32 %v1245_v61, %v453_v18  ;;  %vm1559_vm11 = vmor %vm619_vm2, %vm620_vm6  ;;  %vm635_vm12 = vweird.f32 %v1511_v4 }
 0x1d1   :  { %v616_v15 = vsub.f32 1.0, %v615_v17  ;;  %970 = vpow2.f32 %v507_v22  ;;  %v521_v42 = vmul.f32 1.442695, %v490_v11  ;;  %v626_v26 = vor.u32 1.1754944e-38, %v625_v16  ;;  %vm1587_vm14 = vmor %vm634_vm7, %vm635_vm12 }
 0x1d2   :  { %v631_v21 = vsub.f32 1.0, %v630_v55  ;;  %v489_v5 = vsub.f32 0.0, %v473_v59  ;;  %972 = vpow2.f32 %v517_v33  ;;  %v1580_v56 = vsel %vm1513_vm4, %v1482_v48, %v697_v19  ;;  %vm1603_vm2 = vmor %vm709_vm8, %vm710_vm5 }
 0x1d3   :  { %v617_v6 = vmul.f32 %v1499_v60, %v616_v15  ;;  %v708_v57 = vadd.f32 %v1466_v36, %v707_v24  ;;  %974 = vpow2.f32 %v521_v42  ;;  %vm820_vm15 = vcmask 458112  }
 0x1d4   :  { %v632_v32 = vmul.f32 %v1511_v4, %v631_v21  ;;  %v519_v54 = vmul.f32 1.442695, %v489_v5  ;;  %vm639_vm0 = vcmp.eq.f32.partialorder %v638_v37, 8.507059e+37  ;;  %v641_v31 = vor.u32 1.1754944e-38, %v640_v50 }
 0x1d5   :  { %v1549_v9 = vpop.eup %966  ;;  %v618_v30 = vadd.f32 %v1499_v60, %v617_v6  ;;  %v653_v8 = vand.u32 2147483647, %v1494_v43  ;;  %v655_v10 = vand.u32 2147483648, %v1494_v43  ;;  %v712_v13 = vsel %vm1603_vm2, %v1466_v36, %v708_v57 }
 0x1d6   :  { %v1553_v34 = vpop.eup %968  ;;  %v645_v61 = vmul.f32 %v1549_v9, %v1494_v43  ;;  %v633_v46 = vadd.f32 %v1511_v4, %v632_v32  ;;  %976 = vpow2.f32 %v519_v54  ;;  %vm650_vm1 = vweird.f32 %v1549_v9 }
 0x1d7   :  { %v622_v45 = vsel %vm1559_vm11, %v1499_v60, %v618_v30  ;;  %v720_v29 = vmul.f32 %v1553_v34, %v1505_v2  ;;  %v971_v17 = vpop.eup %970  ;;  %vm649_vm4 = vweird.f32 %v1494_v43  ;;  %vm724_vm5 = vweird.f32 %v1505_v2 }
 0x1d8   :  { %v646_v53 = vsub.f32 1.0, %v645_v61  ;;  %v627_v60 = vsel %vm1544_vm9, %v626_v26, %v622_v45  ;;  %v637_v48 = vsel %vm1587_vm14, %v1511_v4, %v633_v46  ;;  %v1610_v12 = vadd.f32 1.0, %v971_v17  ;;  %v973_v62 = vpop.eup %972  ;;  %vm1617_vm3 = vmor %vm649_vm4, %vm650_vm1 }
 0x1d9   :  { %v721_v58 = vsub.f32 1.0, %v720_v29  ;;  %v815_v14 = vperm.slane %v627_v60, %v1405_v0  ;;  %v642_v15 = vsel %vm639_vm0, %v641_v31, %v637_v48  ;;  %v728_v55 = vand.u32 2147483647, %v1505_v2  ;;  %v975_v19 = vpop.eup %974 }
 0x1da   :  { %v647_v63 = vmul.f32 %v1549_v9, %v646_v53  ;;  %v730_v18 = vand.u32 2147483648, %v1505_v2  ;;  %978 = vrcp.f32 %v1610_v12  ;;  %vm725_vm6 = vweird.f32 %v1553_v34 }
 0x1db   :  { %v722_v3 = vmul.f32 %v1553_v34, %v721_v58  ;;  %v1630_v43 = vadd.f32 1.0, %v973_v62  ;;  %v819_v6 = vperm.slane %v642_v15, %v1472_v40  ;;  %vm654_vm7 = vcmp.eq.f32.partialorder %v653_v8, 8.507059e+37  ;;  %vm1646_vm8 = vmor %vm724_vm5, %vm725_vm6 }
 0x1dc   :  { %v648_v4 = vadd.f32 %v1549_v9, %v647_v63  ;;  %v977_v37 = vpop.eup %976  ;;  %v656_v21 = vor.u32 1.1754944e-38, %v655_v10  ;;  %v1633_v22 = vadd.f32 1.0, %v975_v19  ;;  %v817_v23 = vsel %vm816_vm10, %v815_v14, %v1521_v47 }
 0x1dd   :  { %v723_v36 = vadd.f32 %v1553_v34, %v722_v3  ;;  %v668_v24 = vand.u32 2147483647, %v1610_v12  ;;  %980 = vrcp.f32 %v1630_v43  ;;  %v1642_v20 = vsel %vm1573_vm13, %v1502_v1, %v712_v13 }
 0x1de   :  { %v652_v0 = vsel %vm1617_vm3, %v1549_v9, %v648_v4  ;;  %v670_v59 = vand.u32 2147483648, %v1610_v12  ;;  %982 = vrcp.f32 %v1633_v22  ;;  %v1652_v47 = vadd.f32 1.0, %v977_v37 }
 0x1df   :  { %v657_v11 = vsel %vm654_vm7, %v656_v21, %v652_v0  ;;  %vm1654_vm9 = vcmp.eq.f32.partialorder %v728_v55, 8.507059e+37  ;;  %v731_v30 = vor.u32 1.1754944e-38, %v730_v18  ;;  %v727_v1 = vsel %vm1646_vm8, %v1553_v34, %v723_v36 }
 0x1e0   :  { %vm824_vm10 = vcmask 523712   ;;  %v979_v2 = vpop.eup %978  ;;  %v743_v32 = vand.u32 2147483647, %v1630_v43  ;;  %984 = vrcp.f32 %v1652_v47  ;;  %v821_v33 = vsel %vm820_vm15, %v819_v6, %v817_v23 }
 0x1e1   :  { %v835_v38 = vperm.slane %v1580_v56, %v1444_v28  ;;  %v823_v61 = vperm.slane %v657_v11, %v1475_v41  ;;  %v660_v42 = vmul.f32 %v979_v2, %v1610_v12  ;;  %vm664_vm11 = vweird.f32 %v1610_v12 }
 0x1e2   :  { %v839_v34 = vperm.slane %v1642_v20, %v1497_v27  ;;  %vm1671_vm12 = vcmp.eq.f32.partialorder %v668_v24, 8.507059e+37  ;;  %v671_v45 = vor.u32 1.1754944e-38, %v670_v59  ;;  %v745_v46 = vand.u32 2147483648, %v1630_v43 }
 0x1e3   :  { %v1678_v50 = vsel %vm1654_vm9, %v731_v30, %v727_v1  ;;  %vm828_vm13 = vcmask 589312   ;;  %v981_v41 = vpop.eup %980  ;;  %v661_v29 = vsub.f32 1.0, %v660_v42  ;;  %vm739_vm14 = vweird.f32 %v1630_v43 }
 0x1e4   :  { %vm769_vm15 = vweird.f32 %v1633_v22  ;;  %v773_v51 = vand.u32 2147483647, %v1633_v22  ;;  %vm832_vm0 = vcmask 654912   ;;  %v983_v26 = vpop.eup %982  ;;  %v735_v53 = vmul.f32 %v981_v41, %v1630_v43 }
 0x1e5   :  { %v760_v54 = vand.u32 2147483648, %v1652_v47  ;;  %vm1685_vm1 = vcmp.eq.f32.partialorder %v743_v32, 8.507059e+37  ;;  %v775_v52 = vand.u32 2147483648, %v1633_v22  ;;  %vm836_vm2 = vcmask 720512  }
 0x1e6   :  { %v662_v58 = vmul.f32 %v979_v2, %v661_v29  ;;  %vm665_vm4 = vweird.f32 %v979_v2  ;;  %v765_v60 = vmul.f32 %v983_v26, %v1633_v22  ;;  %v825_v48 = vsel %vm824_vm10, %v823_v61, %v821_v33  ;;  %v985_v63 = vpop.eup %984 }
 0x1e7   :  { %v736_v17 = vsub.f32 1.0, %v735_v53  ;;  %v746_v31 = vor.u32 1.1754944e-38, %v745_v46  ;;  %vm754_vm3 = vweird.f32 %v1652_v47  ;;  %v758_v3 = vand.u32 2147483647, %v1652_v47  ;;  %vm666_vm6 = vmor %vm664_vm11, %vm665_vm4 }
 0x1e8   :  { %v663_v35 = vadd.f32 %v979_v2, %v662_v58  ;;  %v766_v4 = vsub.f32 1.0, %v765_v60  ;;  %v750_v8 = vmul.f32 %v985_v63, %v1652_v47  ;;  %vm1695_vm5 = vcmp.eq.f32.partialorder %v773_v51, 8.507059e+37 }
 0x1e9   :  { %v737_v13 = vmul.f32 %v981_v41, %v736_v17  ;;  %vm740_vm7 = vweird.f32 %v981_v41  ;;  %v761_v14 = vor.u32 1.1754944e-38, %v760_v54  ;;  %v776_v15 = vor.u32 1.1754944e-38, %v775_v52 }
 0x1ea   :  { %v667_v62 = vsel %vm666_vm6, %v979_v2, %v663_v35  ;;  %v751_v16 = vsub.f32 1.0, %v750_v8  ;;  %v767_v55 = vmul.f32 %v983_v26, %v766_v4  ;;  %vm770_vm8 = vweird.f32 %v983_v26  ;;  %vm741_vm10 = vmor %vm739_vm14, %vm740_vm7 }
 0x1eb   :  { %v672_v18 = vsel %vm1671_vm12, %v671_v45, %v667_v62  ;;  %v738_v19 = vadd.f32 %v981_v41, %v737_v13  ;;  %vm840_vm9 = vcmask 786112   ;;  %v842_v0 = vadd.s32 4294967200, %v1273_v44  ;;  %vm771_vm12 = vmor %vm769_vm15, %vm770_vm8 }
 0x1ec   :  { %v827_v36 = vperm.slane %v672_v18, %v1485_v49  ;;  %v752_v12 = vmul.f32 %v985_v63, %v751_v16  ;;  %vm755_vm11 = vweird.f32 %v985_v63  ;;  %v768_v37 = vadd.f32 %v983_v26, %v767_v55 }
 0x1ed   :  { %v742_v6 = vsel %vm741_vm10, %v981_v41, %v738_v19  ;;  %vm1707_vm4 = vcmp.eq.f32.partialorder %v758_v3, 8.507059e+37  ;;  %v846_v23 = vadd.s32 4294967192, %v1273_v44  ;;  %v850_v24 = vadd.s32 4294967184, %v1273_v44  ;;  %vm756_vm14 = vmor %vm754_vm3, %vm755_vm11 }
 0x1ee   :  { %v747_v49 = vsel %vm1685_vm1, %v746_v31, %v742_v6  ;;  %v753_v43 = vadd.f32 %v985_v63, %v752_v12  ;;  %v772_v11 = vsel %vm771_vm12, %v983_v26, %v768_v37  ;;  %v829_v40 = vsel %vm828_vm13, %v827_v36, %v825_v48 }
 0x1ef   :  { %v833_v22 = vsel %vm832_vm0, %v831_v39, %v829_v40  ;;  %v843_v59 = vperm.slane %v1678_v50, %v842_v0  ;;  %vm844_vm15 = vcmask 851712   ;;  %v854_v9 = vadd.s32 4294967176, %v1273_v44 }
 0x1f0   :  { %v757_v30 = vsel %vm756_vm14, %v985_v63, %v753_v43  ;;  %v777_v1 = vsel %vm1695_vm5, %v776_v15, %v772_v11  ;;  %v837_v47 = vsel %vm836_vm2, %v835_v38, %v833_v22  ;;  %vm848_vm13 = vcmask 917312  }
 0x1f1   :  { %v762_v25 = vsel %vm1707_vm4, %v761_v14, %v757_v30  ;;  %v841_v7 = vsel %vm840_vm9, %v839_v34, %v837_v47  ;;  %v847_v39 = vperm.slane %v747_v49, %v846_v23  ;;  %vm852_vm0 = vcmask 982912  }
 0x1f2   :  { %v845_v44 = vsel %vm844_vm15, %v843_v59, %v841_v7  ;;  %v851_v28 = vperm.slane %v762_v25, %v850_v24  ;;  %vm856_vm1 = vcmask 1048512   ;;  %v855_v2 = vperm.slane %v777_v1, %v854_v9 }
 0x1f3   :  { %v849_v56 = vsel %vm848_vm13, %v847_v39, %v845_v44 }
 0x1f4   :  { %v853_v32 = vsel %vm852_vm0, %v851_v28, %v849_v56 }
 0x1f5   :  { %v857_v33 = vsel %vm856_vm1, %v855_v2, %v853_v32 }
 0x1f6   :  { %859 = vst [vmem:[#allocation3] sm:$0x1] %v857_v33 }
 0x1f7   :  { %870 = dma.vmem_to_hbm [thread:$0]  %s866_s29, 16, %s868_s9, [#allocation4]  }
 0x1f8   :  { %1010 = dma.done.wait [#allocation4], 16  }
 0x1f9   :  { %1011 = vsyncadd [#allocation4], 4294967280 }
 0x1fa   :  { %875 = vsyncpa [#allocation4], 1 }

</bundles_post_ra>
